<compile_context>
chip_gen: v7x
topology: tpu7x:2x2x1
jax: 0.10.0
libtpu: 0.0.40
codegen_flags: <defaults>
</compile_context>

<pallas_src>
import functools

import jax
import jax.numpy as jnp
import numpy as np
from jax.experimental import pallas as pl
from jax.experimental.pallas import tpu as pltpu


def critic_kernel(packed_ref, w1_ref, b1_ref, w2s_ref, w2a_ref, b2_ref,
                  w3_ref, b3_ref, out_ref):
    # packed: (TB, PACK) = [state | action | zeros]
    p = packed_ref[...]

    # ---- fcs1 + ReLU: (TB, PACK) @ (PACK, FCS1) on the MXU (action rows of w1 are zero) ----
    xs = jnp.dot(p, w1_ref[...], preferred_element_type=jnp.float32) + b1_ref[...]
    xs = jnp.maximum(xs, 0.0)                                    # (TB, FCS1)

    # ---- fc2 over cat([xs, action]) + ReLU, as split-weight sum of two MXU dots ----
    # xs @ W2_state + packed @ W2_action_padded  (state/zero rows of W2_action_padded are zero)
    x = (jnp.dot(xs, w2s_ref[...], preferred_element_type=jnp.float32)
         + jnp.dot(p, w2a_ref[...], preferred_element_type=jnp.float32)
         + b2_ref[...])
    x = jnp.maximum(x, 0.0)                                      # (TB, FC2)

    # ---- fc3 head on the MXU, producing a lane-dense (1, TB) row directly ----
    # w3_ref is (8, FC2) with only row 0 nonzero; NT dot_general: (8,FC2) . (TB,FC2)^T -> (8,TB)
    q = jax.lax.dot_general(w3_ref[...], x, (((1,), (1,)), ((), ())),
                            preferred_element_type=jnp.float32)  # (8, TB)
    out_ref[...] = (q[0:1, :] + b3_ref[...]).astype(out_ref.dtype)   # (1, TB)


@functools.partial(jax.jit, static_argnames=("block_batch",))
def critic_forward(state, action, params, *, block_batch=4096):
    """Whole critic forward pass in one Pallas call, batch-tiled over a 1-D grid."""
    w1p, b1, w2s, w2ap, b2, w3p, b3 = params
    B, S = state.shape
    A = action.shape[1]
    PACK = w1p.shape[0]          # packed input width (>= S + A, multiple of 8)
    FCS1 = w1p.shape[1]
    FC2 = w2s.shape[1]

    # ---- batch-tile selection (perf review) ----
    TB = min(block_batch, B)
    if B >= 256:
        # keep >= 2 parallel grid steps so the 2nd TensorCore (v7x) gets work
        TB = min(TB, -(-B // 2))
    TB = ((max(TB, 1) + 127) // 128) * 128    # lane-dense output needs TB % 128 == 0
    nsteps = -(-B // TB)
    Bp = nsteps * TB

    # ---- single small packing pass: [state | action | zeros] padded to (Bp, PACK) ----
    packed = jnp.concatenate(
        [state, action, jnp.zeros((B, PACK - S - A), state.dtype)], axis=1)
    if Bp != B:
        packed = jnp.pad(packed, ((0, Bp - B), (0, 0)))

    flops = 2 * Bp * (PACK * FCS1 + FCS1 * FC2 + PACK * FC2 + w3p.shape[0] * FC2)
    bytes_accessed = (packed.size + Bp) * 4 + sum(int(p.size) for p in params) * 4

    out = pl.pallas_call(
        critic_kernel,
        out_shape=jax.ShapeDtypeStruct((1, Bp), jnp.float32),
        grid_spec=pltpu.PrefetchScalarGridSpec(
            num_scalar_prefetch=0,
            grid=(nsteps,),
            in_specs=[
                pl.BlockSpec((TB, PACK), lambda i: (i, 0)),     # packed input (batch-tiled)
                pl.BlockSpec((PACK, FCS1), lambda i: (0, 0)),   # w1 (padded, resident)
                pl.BlockSpec((1, FCS1), lambda i: (0, 0)),      # b1
                pl.BlockSpec((FCS1, FC2), lambda i: (0, 0)),    # w2 state-half
                pl.BlockSpec((PACK, FC2), lambda i: (0, 0)),    # w2 action-half (padded)
                pl.BlockSpec((1, FC2), lambda i: (0, 0)),       # b2
                pl.BlockSpec((8, FC2), lambda i: (0, 0)),       # w3 (row 0 real, rows 1..7 zero)
                pl.BlockSpec((1, 1), lambda i: (0, 0)),         # b3
            ],
            out_specs=pl.BlockSpec((1, TB), lambda i: (0, i)),  # lane-dense Q row
        ),
        compiler_params=pltpu.CompilerParams(
            dimension_semantics=("parallel",)),                 # megacore-shardable
        cost_estimate=pl.CostEstimate(flops=flops, transcendentals=0,
                                      bytes_accessed=bytes_accessed),
    )(packed, w1p, b1, w2s, w2ap, b2, w3p, b3)
    return out[0, :B][:, None]


def init_params(key, state_size, action_size, fcs1_units, fc2_units):
    """Deterministic init mirroring the torch module's uniform ranges.

    Weights are stored as [in, out] (transposed vs. torch) and zero-padded to the
    8-wide packed-input layout used by the kernel.
    """
    ks = jax.random.split(key, 6)
    lim1 = 1.0 / np.sqrt(fcs1_units)   # hidden_init uses weight.size()[0] == out_features
    lim2 = 1.0 / np.sqrt(fc2_units)

    pack = ((state_size + action_size + 7) // 8) * 8

    w1 = jax.random.uniform(ks[0], (state_size, fcs1_units), jnp.float32, -lim1, lim1)
    b1 = jax.random.uniform(ks[1], (1, fcs1_units), jnp.float32, -lim1, lim1)

    w2 = jax.random.uniform(ks[2], (fcs1_units + action_size, fc2_units),
                            jnp.float32, -lim2, lim2)
    b2 = jax.random.uniform(ks[3], (1, fc2_units), jnp.float32, -lim2, lim2)

    w3 = jax.random.uniform(ks[4], (1, fc2_units), jnp.float32, -0.003, 0.003)
    b3 = jax.random.uniform(ks[5], (1, 1), jnp.float32, -0.003, 0.003)

    # Zero-padded layouts matching the packed (B, pack) input [state | action | 0].
    w1_pad = jnp.zeros((pack, fcs1_units), jnp.float32).at[:state_size].set(w1)
    w2s = w2[:fcs1_units]
    w2a_pad = (jnp.zeros((pack, fc2_units), jnp.float32)
               .at[state_size:state_size + action_size].set(w2[fcs1_units:]))
    w3_pad = jnp.zeros((8, fc2_units), jnp.float32).at[0:1].set(w3)

    return (w1_pad, b1, w2s, w2a_pad, b2, w3_pad, b3)


def reference_forward(state, action, params):
    """Pure-JAX reference (same math as the torch forward)."""
    w1p, b1, w2s, w2ap, b2, w3p, b3 = params
    S = state.shape[1]
    A = action.shape[1]
    xs = jnp.maximum(state @ w1p[:S] + b1, 0.0)
    x = jnp.maximum(xs @ w2s + action @ w2ap[S:S + A] + b2, 0.0)
    return x @ w3p[0:1].T + b3


if __name__ == "__main__":
    # Shapes consistent with the module: state_size=2, action_size=3, hidden 64/64.
    STATE, ACTION, FCS1, FC2 = 2, 3, 64, 64

    key = jax.random.PRNGKey(0)
    k_state, k_action, k_params = jax.random.split(key, 3)
    params = init_params(k_params, STATE, ACTION, FCS1, FC2)

    # Case 1: small batch, single-tile grid.
    B1 = 16
    state1 = jax.random.normal(k_state, (B1, STATE), jnp.float32)
    action1 = jax.random.normal(k_action, (B1, ACTION), jnp.float32)
    q1 = jax.block_until_ready(critic_forward(state1, action1, params))
    np.testing.assert_allclose(np.asarray(q1),
                               np.asarray(reference_forward(state1, action1, params)),
                               rtol=1e-5, atol=1e-5)

    # Case 2: multi-step "parallel" grid with batch padding (B not a tile multiple).
    B2 = 300
    state2 = jax.random.normal(jax.random.fold_in(k_state, 1), (B2, STATE), jnp.float32)
    action2 = jax.random.normal(jax.random.fold_in(k_action, 1), (B2, ACTION), jnp.float32)
    q2 = jax.block_until_ready(critic_forward(state2, action2, params, block_batch=128))
    np.testing.assert_allclose(np.asarray(q2),
                               np.asarray(reference_forward(state2, action2, params)),
                               rtol=1e-5, atol=1e-5)

    print("KERNEL_OK")
</pallas_src>

<mosaic_0001>
module attributes {stable_mosaic.version = 11 : i64} {
  func.func @critic_kernel(%arg0: i32, %arg1: memref<128x8xf32, #tpu.memory_space<vmem>>, %arg2: memref<8x64xf32, #tpu.memory_space<vmem>>, %arg3: memref<1x64xf32, #tpu.memory_space<vmem>>, %arg4: memref<64x64xf32, #tpu.memory_space<vmem>>, %arg5: memref<8x64xf32, #tpu.memory_space<vmem>>, %arg6: memref<1x64xf32, #tpu.memory_space<vmem>>, %arg7: memref<8x64xf32, #tpu.memory_space<vmem>>, %arg8: memref<1x1xf32, #tpu.memory_space<vmem>>, %arg9: memref<1x128xf32, #tpu.memory_space<vmem>>) attributes {dimension_semantics = [#tpu.dimension_semantics<parallel>], iteration_bounds = array<i64: 1>, scalar_prefetch = 0 : i64, scratch_operands = 0 : i64, tpu.core_type = #tpu.core_type<tc>, window_params = [{transform_indices = @transform_0, window_bounds = array<i64: 128, 8>}, {pipeline_mode = #tpu.pipeline_mode<synchronous>, transform_indices = @transform_1, window_bounds = array<i64: 8, 64>}, {pipeline_mode = #tpu.pipeline_mode<synchronous>, transform_indices = @transform_2, window_bounds = array<i64: 1, 64>}, {pipeline_mode = #tpu.pipeline_mode<synchronous>, transform_indices = @transform_3, window_bounds = array<i64: 64, 64>}, {pipeline_mode = #tpu.pipeline_mode<synchronous>, transform_indices = @transform_4, window_bounds = array<i64: 8, 64>}, {pipeline_mode = #tpu.pipeline_mode<synchronous>, transform_indices = @transform_5, window_bounds = array<i64: 1, 64>}, {pipeline_mode = #tpu.pipeline_mode<synchronous>, transform_indices = @transform_6, window_bounds = array<i64: 8, 64>}, {pipeline_mode = #tpu.pipeline_mode<synchronous>, transform_indices = @transform_7, window_bounds = array<i64: 1, 1>}, {transform_indices = @transform_8, window_bounds = array<i64: 1, 128>}]} {
    %c0 = arith.constant 0 : index
    %c0_0 = arith.constant 0 : index
    %0 = vector.load %arg1[%c0, %c0_0] : memref<128x8xf32, #tpu.memory_space<vmem>>, vector<128x8xf32>
    %c0_1 = arith.constant 0 : index
    %c0_2 = arith.constant 0 : index
    %1 = vector.load %arg2[%c0_1, %c0_2] : memref<8x64xf32, #tpu.memory_space<vmem>>, vector<8x64xf32>
    %cst = arith.constant dense<0.000000e+00> : vector<128x64xf32>
    %2 = tpu.matmul %0, %1, %cst {dimension_numbers = #tpu.dot_dimension_numbers<[1], [0], [0], [1], [0, 0, 1, 1], [], []>} : vector<128x8xf32>, vector<8x64xf32>, vector<128x64xf32> -> vector<128x64xf32>
    %c0_3 = arith.constant 0 : index
    %c0_4 = arith.constant 0 : index
    %3 = vector.load %arg3[%c0_3, %c0_4] : memref<1x64xf32, #tpu.memory_space<vmem>>, vector<1x64xf32>
    %4 = vector.broadcast %3 : vector<1x64xf32> to vector<128x64xf32>
    %5 = arith.addf %2, %4 : vector<128x64xf32>
    %cst_5 = arith.constant 0.000000e+00 : f32
    %6 = vector.broadcast %cst_5 : f32 to vector<128x64xf32>
    %7 = arith.maximumf %5, %6 : vector<128x64xf32>
    %c0_6 = arith.constant 0 : index
    %c0_7 = arith.constant 0 : index
    %8 = vector.load %arg4[%c0_6, %c0_7] : memref<64x64xf32, #tpu.memory_space<vmem>>, vector<64x64xf32>
    %cst_8 = arith.constant dense<0.000000e+00> : vector<128x64xf32>
    %9 = tpu.matmul %7, %8, %cst_8 {dimension_numbers = #tpu.dot_dimension_numbers<[1], [0], [0], [1], [0, 0, 1, 1], [], []>} : vector<128x64xf32>, vector<64x64xf32>, vector<128x64xf32> -> vector<128x64xf32>
    %c0_9 = arith.constant 0 : index
    %c0_10 = arith.constant 0 : index
    %10 = vector.load %arg5[%c0_9, %c0_10] : memref<8x64xf32, #tpu.memory_space<vmem>>, vector<8x64xf32>
    %cst_11 = arith.constant dense<0.000000e+00> : vector<128x64xf32>
    %11 = tpu.matmul %0, %10, %cst_11 {dimension_numbers = #tpu.dot_dimension_numbers<[1], [0], [0], [1], [0, 0, 1, 1], [], []>} : vector<128x8xf32>, vector<8x64xf32>, vector<128x64xf32> -> vector<128x64xf32>
    %12 = arith.addf %9, %11 : vector<128x64xf32>
    %c0_12 = arith.constant 0 : index
    %c0_13 = arith.constant 0 : index
    %13 = vector.load %arg6[%c0_12, %c0_13] : memref<1x64xf32, #tpu.memory_space<vmem>>, vector<1x64xf32>
    %14 = vector.broadcast %13 : vector<1x64xf32> to vector<128x64xf32>
    %15 = arith.addf %12, %14 : vector<128x64xf32>
    %cst_14 = arith.constant 0.000000e+00 : f32
    %16 = vector.broadcast %cst_14 : f32 to vector<128x64xf32>
    %17 = arith.maximumf %15, %16 : vector<128x64xf32>
    %c0_15 = arith.constant 0 : index
    %c0_16 = arith.constant 0 : index
    %18 = vector.load %arg7[%c0_15, %c0_16] : memref<8x64xf32, #tpu.memory_space<vmem>>, vector<8x64xf32>
    %cst_17 = arith.constant dense<0.000000e+00> : vector<8x128xf32>
    %19 = tpu.matmul %18, %17, %cst_17 {dimension_numbers = #tpu.dot_dimension_numbers<[1], [1], [0], [0], [0, 0, 1, 0], [], []>} : vector<8x64xf32>, vector<128x64xf32>, vector<8x128xf32> -> vector<8x128xf32>
    %20 = vector.extract_strided_slice %19 {offsets = [0, 0], sizes = [1, 128], strides = [1, 1]} : vector<8x128xf32> to vector<1x128xf32>
    %c0_18 = arith.constant 0 : index
    %c0_19 = arith.constant 0 : index
    %21 = vector.load %arg8[%c0_18, %c0_19] : memref<1x1xf32, #tpu.memory_space<vmem>>, vector<1x1xf32>
    %22 = vector.broadcast %21 : vector<1x1xf32> to vector<1x128xf32>
    %23 = arith.addf %20, %22 : vector<1x128xf32>
    %c0_20 = arith.constant 0 : index
    %c0_21 = arith.constant 0 : index
    %24 = vector.load %arg9[%c0_20, %c0_21] : memref<1x128xf32, #tpu.memory_space<vmem>>, vector<1x128xf32>
    tpu.vector_store %arg9[%c0_20, %c0_21], %23 {strides = array<i32>} : memref<1x128xf32, #tpu.memory_space<vmem>>, vector<1x128xf32>,
    return
  }
  func.func @transform_0(%arg0: i32) -> (i32, i32) {
    %c0_i32 = arith.constant 0 : i32
    %c0_i32_0 = arith.constant 0 : i32
    return %arg0, %c0_i32 : i32, i32
  }
  func.func @transform_1(%arg0: i32) -> (i32, i32) {
    %c0_i32 = arith.constant 0 : i32
    %c0_i32_0 = arith.constant 0 : i32
    %c0_i32_1 = arith.constant 0 : i32
    return %c0_i32, %c0_i32_0 : i32, i32
  }
  func.func @transform_2(%arg0: i32) -> (i32, i32) {
    %c0_i32 = arith.constant 0 : i32
    %c0_i32_0 = arith.constant 0 : i32
    %c0_i32_1 = arith.constant 0 : i32
    return %c0_i32, %c0_i32_0 : i32, i32
  }
  func.func @transform_3(%arg0: i32) -> (i32, i32) {
    %c0_i32 = arith.constant 0 : i32
    %c0_i32_0 = arith.constant 0 : i32
    %c0_i32_1 = arith.constant 0 : i32
    return %c0_i32, %c0_i32_0 : i32, i32
  }
  func.func @transform_4(%arg0: i32) -> (i32, i32) {
    %c0_i32 = arith.constant 0 : i32
    %c0_i32_0 = arith.constant 0 : i32
    %c0_i32_1 = arith.constant 0 : i32
    return %c0_i32, %c0_i32_0 : i32, i32
  }
  func.func @transform_5(%arg0: i32) -> (i32, i32) {
    %c0_i32 = arith.constant 0 : i32
    %c0_i32_0 = arith.constant 0 : i32
    %c0_i32_1 = arith.constant 0 : i32
    return %c0_i32, %c0_i32_0 : i32, i32
  }
  func.func @transform_6(%arg0: i32) -> (i32, i32) {
    %c0_i32 = arith.constant 0 : i32
    %c0_i32_0 = arith.constant 0 : i32
    %c0_i32_1 = arith.constant 0 : i32
    return %c0_i32, %c0_i32_0 : i32, i32
  }
  func.func @transform_7(%arg0: i32) -> (i32, i32) {
    %c0_i32 = arith.constant 0 : i32
    %c0_i32_0 = arith.constant 0 : i32
    %c0_i32_1 = arith.constant 0 : i32
    return %c0_i32, %c0_i32_0 : i32, i32
  }
  func.func @transform_8(%arg0: i32) -> (i32, i32) {
    %c0_i32 = arith.constant 0 : i32
    %c0_i32_0 = arith.constant 0 : i32
    return %c0_i32, %arg0 : i32, i32
  }
}

</mosaic_0001>

<bundles_post_ra>
// kernel: critic_forward.1
= control target key start
LH: loop header
LB: loop body
LE: loop exit
PB: predicated region body
PF: predicated region fallthrough
CT: control target
= control target key end

     0   :  { %vm55_vm0 = vcmask 64512   ;;  %vm419_vm1 = vcmask 523264   ;;  %vm1129_vm2 = vmmov 0   ;;  %s1349_s1 = inlined_call_operand.vmem [shape: f32[8,64], index: 1, kind: input, shape index: {}]   ;;  %s1350_s0 = inlined_call_operand.vmem [shape: f32[128,8], index: 0, kind: input, shape index: {}]   ;;  %s1351_s4 = inlined_call_operand.vmem [shape: f32[8,64], index: 4, kind: input, shape index: {}]   ;;  %s1352_s3 = inlined_call_operand.vmem [shape: f32[64,64], index: 3, kind: input, shape index: {}]   ;;  %s1353_s2 = inlined_call_operand.vmem [shape: f32[1,64], index: 2, kind: input, shape index: {}]   ;;  %s1354_s7 = inlined_call_operand.<no memory space> [shape: f32[1,1], index: 7, kind: input, shape index: {}]   ;;  %s1355_s5 = inlined_call_operand.vmem [shape: f32[1,64], index: 5, kind: input, shape index: {}]   ;;  %s1356_s6 = inlined_call_operand.vmem [shape: f32[8,64], index: 6, kind: input, shape index: {}]   ;;  %s1357_s8 = inlined_call_operand.vmem [shape: f32[1,128], index: 8, kind: output, shape index: {}]  }
   0x1   :  { %v47_v0 = vld [vmem:[%s1349_s1] sm:$0xff]  ;;  %v32_v2 = vld [vmem:[%s1350_s0 + $0x8] sm:$0xff]  ;;  %v33_v3 = vld [vmem:[%s1350_s0 + $0x10] sm:$0xff] }
   0x2   :  { %v31_v1 = vld [vmem:[%s1350_s0] sm:$0xff]  ;;  %932 = vmatprep.subr.mxu0 %v47_v0  ;;  %v34_v4 = vld [vmem:[%s1350_s0 + $0x18] sm:$0xff]  ;;  %v266_v8 = vld [vmem:[%s1352_s3 + $0x8] sm:$0xff] }
   0x3   :  { %934 = vmatprep.mubr.msk.f32.mxu0 %vm55_vm0, %v31_v1  ;;  %933 = vmatpush3.msra.mxu0 %v47_v0  ;;  %v35_v5 = vld [vmem:[%s1350_s0 + $0x20] sm:$0xff]  ;;  %v267_v9 = vld [vmem:[%s1352_s3 + $0x10] sm:$0xff]  ;;  %v268_v11 = vld [vmem:[%s1352_s3 + $0x18] sm:$0xff] }
   0x4   :  { %960 = vmatprep.mubr.msk.f32.mxu1 %vm55_vm0, %v31_v1  ;;  %935 = vmatmul.mubr.msk.f32.vlgmr.msra.gmra.mrb[0].mxu0 %vm55_vm0, %v32_v2  ;;  %v273_v6 = vld [vmem:[%s1351_s4] sm:$0xff]  ;;  %v36_v12 = vld [vmem:[%s1350_s0 + $0x28] sm:$0xff]  ;;  %v1063_v13 = vpack.c.bf16 %v268_v11, %v267_v9  ;;  %v37_v16 = vld [vmem:[%s1350_s0 + $0x30] sm:$0xff] }
   0x5   :  { %937 = vmatprep.mubr.msk.f32.mxu0 %vm55_vm0, %v33_v3  ;;  %958 = vmatprep.subr.mxu1 %v273_v6  ;;  %v265_v7 = vld [vmem:[%s1352_s3] sm:$0xff]  ;;  %v270_v15 = vld [vmem:[%s1352_s3 + $0x28] sm:$0xff]  ;;  %v38_v18 = vld [vmem:[%s1350_s0 + $0x38] sm:$0xff] }
   0x6   :  { %959 = vmatpush3.msra.mxu1 %v273_v6  ;;  %v1059_v10 = vpack.c.bf16 %v266_v8, %v265_v7  ;;  %v269_v14 = vld [vmem:[%s1352_s3 + $0x20] sm:$0xff]  ;;  %v271_v19 = vld [vmem:[%s1352_s3 + $0x30] sm:$0xff]  ;;  %v272_v20 = vld [vmem:[%s1352_s3 + $0x38] sm:$0xff] }
   0x7   :  { %961 = vmatmul.mubr.msk.f32.vlgmr.msra.gmra.mrb[0].mxu1 %vm55_vm0, %v32_v2  ;;  %v1067_v17 = vpack.c.bf16 %v270_v15, %v269_v14  ;;  %v39_v21 = vld [vmem:[%s1350_s0 + $0x40] sm:$0xff]  ;;  %v1071_v22 = vpack.c.bf16 %v272_v20, %v271_v19  ;;  %v40_v23 = vld [vmem:[%s1350_s0 + $0x48] sm:$0xff]  ;;  %v41_v24 = vld [vmem:[%s1350_s0 + $0x50] sm:$0xff]  ;;  %v1128_v15 = vmov 0.0|0.0  }
   0x8   :  { %938 = vmatmul.mubr.msk.f32.gmra.mrb[2].mxu0 %vm55_vm0, %v34_v4  ;;  %1060 = vmatprep.subr.bf16.mxu1 %v1059_v10  ;;  %v42_v25 = vld [vmem:[%s1350_s0 + $0x58] sm:$0xff]  ;;  %v43_v26 = vld [vmem:[%s1350_s0 + $0x60] sm:$0xff]  ;;  %v44_v27 = vld [vmem:[%s1350_s0 + $0x68] sm:$0xff] }
   0x9   :  { %940 = vmatprep.mubr.msk.f32.mxu0 %vm55_vm0, %v35_v5  ;;  %963 = vmatprep.mubr.msk.f32.mxu1 %vm55_vm0, %v33_v3  ;;  %v45_v28 = vld [vmem:[%s1350_s0 + $0x70] sm:$0xff]  ;;  %v46_v29 = vld [vmem:[%s1350_s0 + $0x78] sm:$0xff]  ;;  %v790_v30 = vld [vmem:[%s1353_s2] ss:$0 sm:$0xff] }
   0xa   :  { %1062 = vmatpush3.bf16.msra.mxu1 %v1059_v10  ;;  %1075 = vmatprep.subr.bf16.mxu0 %v1128_v15  ;;  %v839_v20 = vld [vmem:[%s1355_s5] ss:$0 sm:$0xff]  ;;  %vm1315_vm3 = vmpackc.low %vm419_vm1, %vm419_vm1 }
   0xb   :  { %1064 = vmatprep.subr.bf16.mxu1 %v1063_v13  ;;  %964 = vmatmul.mubr.msk.f32.gmra.mrb[2].mxu1 %vm55_vm0, %v34_v4 }
   0xc   :  { %941 = vmatmul.mubr.msk.f32.gmra.mrb[4].mxu0 %vm55_vm0, %v36_v12  ;;  %966 = vmatprep.mubr.msk.f32.mxu1 %vm55_vm0, %v35_v5 }
   0xd   :  { %943 = vmatprep.mubr.msk.f32.mxu0 %vm55_vm0, %v37_v16 }
   0xe   :  { %1066 = vmatpush3.bf16.msra.mxu1 %v1063_v13 }
   0xf   :  { %1068 = vmatprep.subr.bf16.mxu1 %v1067_v17  ;;  %967 = vmatmul.mubr.msk.f32.gmra.mrb[4].mxu1 %vm55_vm0, %v36_v12 }
  0x10   :  { %944 = vmatmul.mubr.msk.f32.gmra.mrb[6].mxu0 %vm55_vm0, %v38_v18  ;;  %969 = vmatprep.mubr.msk.f32.mxu1 %vm55_vm0, %v37_v16  ;;  %v1130_v16 = vmov 0.0  }
  0x11   :  { %946 = vmatprep.mubr.msk.f32.mxu0 %vm55_vm0, %v39_v21 }
  0x12   :  { %1070 = vmatpush3.bf16.msra.mxu1 %v1067_v17  ;;  %v1131_v17 = vmov 0  }
  0x13   :  { %1072 = vmatprep.subr.bf16.mxu1 %v1071_v22  ;;  %970 = vmatmul.mubr.msk.f32.gmra.mrb[6].mxu1 %vm55_vm0, %v38_v18  ;;  %v13_v18 = vstv %s1354_s7 }
  0x14   :  { %947 = vmatmul.mubr.msk.f32.gmra.mrb[8].mxu0 %vm55_vm0, %v40_v23  ;;  %972 = vmatprep.mubr.msk.f32.mxu1 %vm55_vm0, %v39_v21  ;;  %14 = vst [vmem:[#allocation2] sm:$0x1] %v13_v18 }
  0x15   :  { %949 = vmatprep.mubr.msk.f32.mxu0 %vm55_vm0, %v41_v24  ;;  %1127 = vset.pattern.permute.xlu0 %v1131_v17 }
  0x16   :  { %1074 = vmatpush3.bf16.msra.mxu1 %v1071_v22 }
  0x17   :  { %973 = vmatmul.mubr.msk.f32.gmra.mrb[8].mxu1 %vm55_vm0, %v40_v23 }
  0x18   :  { %950 = vmatmul.mubr.msk.f32.gmra.mrb[10].mxu0 %vm55_vm0, %v42_v25  ;;  %975 = vmatprep.mubr.msk.f32.mxu1 %vm55_vm0, %v41_v24 }
  0x19   :  { %952 = vmatprep.mubr.msk.f32.mxu0 %vm55_vm0, %v43_v26 }
  0x1b   :  { %976 = vmatmul.mubr.msk.f32.gmra.mrb[10].mxu1 %vm55_vm0, %v42_v25  ;;  %v774_v19 = vld [vmem:[#allocation2] sm:$0x1] }
  0x1c   :  { %953 = vmatmul.mubr.msk.f32.gmra.mrb[12].mxu0 %vm55_vm0, %v44_v27  ;;  %978 = vmatprep.mubr.msk.f32.mxu1 %vm55_vm0, %v43_v26 }
  0x1d   :  { %955 = vmatprep.mubr.msk.f32.mxu0 %vm55_vm0, %v45_v28  ;;  %777 = vperm.xlu0 %1127, %v774_v19  }
  0x1f   :  { %979 = vmatmul.mubr.msk.f32.gmra.mrb[12].mxu1 %vm55_vm0, %v44_v27 }
  0x20   :  { %956 = vmatmul.mubr.msk.f32.gmra.mrb[14].mxu0 %vm55_vm0, %v46_v29  ;;  %981 = vmatprep.mubr.msk.f32.mxu1 %vm55_vm0, %v45_v28 }
  0x21   :  { %1056 = vmatprep.mubr.msk.f32.mxu0 %vm1129_vm2, %v1130_v16  ;;  %v780_v16 = vlaneseq }
  0x23   :  { %982 = vmatmul.mubr.msk.f32.gmra.mrb[14].mxu1 %vm55_vm0, %v46_v29  ;;  %v781_v17 = vshrl.u32 %v780_v16, 7 }
  0x25   :  { %v782_v18 = vsub.s32 0, %v781_v17 }
  0x9c   :  { %v778_v19 = vpop.permute.xlu0 %777 }
  0xd7   :  { %v936_v31 = vpop.f32.mrb[0].mxu0 }
  0xd8   :  { %v176_v32 = vadd.f32 %v936_v31, %v790_v30  ;;  %v170_v33 = vpop.f32.mrb[1].mxu0 }
  0xd9   :  { %v171_v34 = vadd.f32 %v790_v30, %v170_v33 }
  0xda   :  { %v250_v37 = vmax.f32 %v176_v32, 0.0 }
  0xdb   :  { %v249_v35 = vmax.f32 %v171_v34, 0.0  ;;  %v939_v36 = vpop.f32.mrb[2].mxu0 }
  0xdc   :  { %v186_v38 = vadd.f32 %v939_v36, %v790_v30  ;;  %v180_v39 = vpop.f32.mrb[3].mxu0 }
  0xdd   :  { %v181_v40 = vadd.f32 %v790_v30, %v180_v39  ;;  %1000 = vmatprep.mubr.msk.f32.mxu1 %vm419_vm1, %v249_v35 }
  0xde   :  { %v252_v41 = vmax.f32 %v186_v38, 0.0  ;;  %1001 = vmatmul.mubr.msk.f32.vlgmr.msra.gmra.mrb[0].mxu1 %vm419_vm1, %v250_v37 }
  0xdf   :  { %v251_v42 = vmax.f32 %v181_v40, 0.0  ;;  %v942_v43 = vpop.f32.mrb[4].mxu0 }
  0xe0   :  { %v196_v44 = vadd.f32 %v942_v43, %v790_v30  ;;  %v190_v45 = vpop.f32.mrb[5].mxu0 }
  0xe1   :  { %v191_v46 = vadd.f32 %v790_v30, %v190_v45  ;;  %1003 = vmatprep.mubr.msk.f32.mxu1 %vm419_vm1, %v251_v42 }
  0xe2   :  { %v254_v47 = vmax.f32 %v196_v44, 0.0  ;;  %1004 = vmatmul.mubr.msk.f32.gmra.mrb[2].mxu1 %vm419_vm1, %v252_v41 }
  0xe3   :  { %v253_v48 = vmax.f32 %v191_v46, 0.0  ;;  %v945_v49 = vpop.f32.mrb[6].mxu0 }
  0xe4   :  { %v206_v50 = vadd.f32 %v945_v49, %v790_v30  ;;  %v200_v51 = vpop.f32.mrb[7].mxu0 }
  0xe5   :  { %v201_v52 = vadd.f32 %v790_v30, %v200_v51  ;;  %1006 = vmatprep.mubr.msk.f32.mxu1 %vm419_vm1, %v253_v48 }
  0xe6   :  { %v256_v53 = vmax.f32 %v206_v50, 0.0  ;;  %1007 = vmatmul.mubr.msk.f32.gmra.mrb[4].mxu1 %vm419_vm1, %v254_v47 }
  0xe7   :  { %v255_v54 = vmax.f32 %v201_v52, 0.0  ;;  %v948_v55 = vpop.f32.mrb[8].mxu0 }
  0xe8   :  { %v216_v56 = vadd.f32 %v948_v55, %v790_v30  ;;  %v210_v57 = vpop.f32.mrb[9].mxu0 }
  0xe9   :  { %v211_v58 = vadd.f32 %v790_v30, %v210_v57  ;;  %1009 = vmatprep.mubr.msk.f32.mxu1 %vm419_vm1, %v255_v54 }
  0xea   :  { %v258_v59 = vmax.f32 %v216_v56, 0.0  ;;  %1010 = vmatmul.mubr.msk.f32.gmra.mrb[6].mxu1 %vm419_vm1, %v256_v53 }
  0xeb   :  { %v257_v60 = vmax.f32 %v211_v58, 0.0  ;;  %v951_v61 = vpop.f32.mrb[10].mxu0 }
  0xec   :  { %v226_v62 = vadd.f32 %v951_v61, %v790_v30  ;;  %v220_v63 = vpop.f32.mrb[11].mxu0 }
  0xed   :  { %v221_v0 = vadd.f32 %v790_v30, %v220_v63  ;;  %1012 = vmatprep.mubr.msk.f32.mxu1 %vm419_vm1, %v257_v60 }
  0xee   :  { %v260_v1 = vmax.f32 %v226_v62, 0.0  ;;  %1013 = vmatmul.mubr.msk.f32.gmra.mrb[8].mxu1 %vm419_vm1, %v258_v59 }
  0xef   :  { %v259_v2 = vmax.f32 %v221_v0, 0.0  ;;  %v954_v3 = vpop.f32.mrb[12].mxu0 }
  0xf0   :  { %v236_v4 = vadd.f32 %v954_v3, %v790_v30  ;;  %v230_v5 = vpop.f32.mrb[13].mxu0 }
  0xf1   :  { %v231_v6 = vadd.f32 %v790_v30, %v230_v5  ;;  %1015 = vmatprep.mubr.msk.f32.mxu1 %vm419_vm1, %v259_v2 }
  0xf2   :  { %v262_v7 = vmax.f32 %v236_v4, 0.0  ;;  %1016 = vmatmul.mubr.msk.f32.gmra.mrb[10].mxu1 %vm419_vm1, %v260_v1 }
  0xf3   :  { %v261_v8 = vmax.f32 %v231_v6, 0.0  ;;  %v957_v9 = vpop.f32.mrb[14].mxu0 }
  0xf4   :  { %v246_v10 = vadd.f32 %v957_v9, %v790_v30  ;;  %v240_v11 = vpop.f32.mrb[15].mxu0 }
  0xf5   :  { %v241_v12 = vadd.f32 %v790_v30, %v240_v11  ;;  %1018 = vmatprep.mubr.msk.f32.mxu1 %vm419_vm1, %v261_v8 }
  0xf6   :  { %v264_v13 = vmax.f32 %v246_v10, 0.0  ;;  %1019 = vmatmul.mubr.msk.f32.gmra.mrb[12].mxu1 %vm419_vm1, %v262_v7 }
  0xf7   :  { %v263_v14 = vmax.f32 %v241_v12, 0.0 }
  0xf9   :  { %1021 = vmatprep.mubr.msk.f32.mxu1 %vm419_vm1, %v263_v14  ;;  %v652_v14 = vld [vmem:[%s1356_s6] sm:$0xff] }
  0xfa   :  { %1022 = vmatmul.mubr.msk.f32.gmra.mrb[14].mxu1 %vm419_vm1, %v264_v13 }
 0x1b1   :  { %v1002_v21 = vpop.f32.mrb[0].mxu1 }
 0x1b2   :  { %v621_v22 = vadd.f32 %v1002_v21, %v839_v20  ;;  %v534_v23 = vpop.f32.mrb[1].mxu1 }
 0x1b3   :  { %v620_v24 = vadd.f32 %v839_v20, %v534_v23 }
 0x1b4   :  { %v637_v25 = vmax.f32 %v621_v22, 0.0 }
 0x1b5   :  { %v636_v26 = vmax.f32 %v620_v24, 0.0  ;;  %v1005_v27 = vpop.f32.mrb[2].mxu1 }
 0x1b6   :  { %v623_v28 = vadd.f32 %v1005_v27, %v839_v20  ;;  %v544_v29 = vpop.f32.mrb[3].mxu1 }
 0x1b7   :  { %v1076_v31 = vpack.c.bf16 %v637_v25, %v636_v26  ;;  %v622_v32 = vadd.f32 %v839_v20, %v544_v29 }
 0x1b8   :  { %v639_v33 = vmax.f32 %v623_v28, 0.0 }
 0x1b9   :  { %v638_v34 = vmax.f32 %v622_v32, 0.0  ;;  %v1008_v35 = vpop.f32.mrb[4].mxu1  ;;  %1078 = vmatpush3.bf16.xpose.msk.msra.mxu0 %vm1315_vm3, %v1076_v31 }
 0x1ba   :  { %v625_v36 = vadd.f32 %v1008_v35, %v839_v20  ;;  %v554_v37 = vpop.f32.mrb[5].mxu1  ;;  %1079 = vmatprep.subr.bf16.mxu0 %v1128_v15 }
 0x1bb   :  { %v1080_v38 = vpack.c.bf16 %v639_v33, %v638_v34  ;;  %v624_v39 = vadd.f32 %v839_v20, %v554_v37 }
 0x1bc   :  { %v641_v40 = vmax.f32 %v625_v36, 0.0 }
 0x1bd   :  { %v640_v41 = vmax.f32 %v624_v39, 0.0  ;;  %v1011_v42 = vpop.f32.mrb[6].mxu1 }
 0x1be   :  { %v627_v43 = vadd.f32 %v1011_v42, %v839_v20  ;;  %v564_v44 = vpop.f32.mrb[7].mxu1 }
 0x1bf   :  { %v1084_v45 = vpack.c.bf16 %v641_v40, %v640_v41  ;;  %v626_v46 = vadd.f32 %v839_v20, %v564_v44 }
 0x1c0   :  { %v643_v47 = vmax.f32 %v627_v43, 0.0 }
 0x1c1   :  { %v642_v48 = vmax.f32 %v626_v46, 0.0  ;;  %v1014_v49 = vpop.f32.mrb[8].mxu1  ;;  %1082 = vmatpush3.bf16.xpose.msk.msra.mxu0 %vm1315_vm3, %v1080_v38 }
 0x1c2   :  { %v629_v50 = vadd.f32 %v1014_v49, %v839_v20  ;;  %v574_v51 = vpop.f32.mrb[9].mxu1  ;;  %1083 = vmatprep.subr.bf16.mxu0 %v1128_v15 }
 0x1c3   :  { %v1088_v52 = vpack.c.bf16 %v643_v47, %v642_v48  ;;  %v628_v53 = vadd.f32 %v839_v20, %v574_v51 }
 0x1c4   :  { %v645_v54 = vmax.f32 %v629_v50, 0.0 }
 0x1c5   :  { %v644_v55 = vmax.f32 %v628_v53, 0.0  ;;  %v1017_v56 = vpop.f32.mrb[10].mxu1 }
 0x1c6   :  { %v631_v57 = vadd.f32 %v1017_v56, %v839_v20  ;;  %v584_v58 = vpop.f32.mrb[11].mxu1 }
 0x1c7   :  { %v1092_v59 = vpack.c.bf16 %v645_v54, %v644_v55  ;;  %v630_v60 = vadd.f32 %v839_v20, %v584_v58 }
 0x1c8   :  { %v647_v61 = vmax.f32 %v631_v57, 0.0 }
 0x1c9   :  { %v646_v62 = vmax.f32 %v630_v60, 0.0  ;;  %v1020_v63 = vpop.f32.mrb[12].mxu1  ;;  %1086 = vmatpush3.bf16.xpose.msk.msra.mxu0 %vm1315_vm3, %v1084_v45 }
 0x1ca   :  { %v633_v0 = vadd.f32 %v1020_v63, %v839_v20  ;;  %v594_v1 = vpop.f32.mrb[13].mxu1  ;;  %1087 = vmatprep.subr.bf16.mxu0 %v1128_v15 }
 0x1cb   :  { %v1096_v2 = vpack.c.bf16 %v647_v61, %v646_v62  ;;  %v632_v3 = vadd.f32 %v839_v20, %v594_v1 }
 0x1cc   :  { %v649_v4 = vmax.f32 %v633_v0, 0.0 }
 0x1cd   :  { %v648_v5 = vmax.f32 %v632_v3, 0.0  ;;  %v1023_v6 = vpop.f32.mrb[14].mxu1 }
 0x1ce   :  { %v635_v7 = vadd.f32 %v1023_v6, %v839_v20  ;;  %v604_v8 = vpop.f32.mrb[15].mxu1 }
 0x1cf   :  { %v1100_v9 = vpack.c.bf16 %v649_v4, %v648_v5  ;;  %v634_v10 = vadd.f32 %v839_v20, %v604_v8  ;;  %v783_v20 = vrot.slane %v778_v19, %v782_v18 }
 0x1d0   :  { %v651_v11 = vmax.f32 %v635_v7, 0.0 }
 0x1d1   :  { %v650_v12 = vmax.f32 %v634_v10, 0.0  ;;  %1090 = vmatpush3.bf16.xpose.msk.msra.mxu0 %vm1315_vm3, %v1088_v52 }
 0x1d2   :  { %1091 = vmatprep.subr.bf16.mxu0 %v1128_v15 }
 0x1d3   :  { %v1104_v13 = vpack.c.bf16 %v651_v11, %v650_v12 }
 0x1d9   :  { %1094 = vmatpush3.bf16.xpose.msk.msra.mxu0 %vm1315_vm3, %v1092_v59 }
 0x1da   :  { %1095 = vmatprep.subr.bf16.mxu0 %v1128_v15 }
 0x1e1   :  { %1098 = vmatpush3.bf16.xpose.msk.msra.mxu0 %vm1315_vm3, %v1096_v2 }
 0x1e2   :  { %1099 = vmatprep.subr.bf16.mxu0 %v1128_v15 }
 0x1e9   :  { %1102 = vmatpush3.bf16.xpose.msk.msra.mxu0 %vm1315_vm3, %v1100_v9 }
 0x1ea   :  { %1103 = vmatprep.subr.bf16.mxu0 %v1128_v15 }
 0x1f1   :  { %1106 = vmatpush3.bf16.xpose.msk.msra.mxu0 %vm1315_vm3, %v1104_v13 }
 0x1f8   :  { %1057 = vmatmul.mubr.msk.f32.vlgmr.msra.gmra.mrb[16].mxu0 %vm419_vm1, %v652_v14 }
 0x2cb   :  { %v770_v21 = vpop.f32.mrb[16].mxu0 }
 0x2cc   :  { %v784_v22 = vadd.f32 %v783_v20, %v770_v21  ;;  %v1058_v23 = vpop.f32.mrb[17].mxu0 }
 0x2ce   :  { %785 = vst [vmem:[%s1357_s8] sm:$0x1] %v784_v22 }

</bundles_post_ra>
